<compile_context>
chip_gen: v6e
topology: v6e:2x2x1
jax: 0.10.0
libtpu: 0.0.40
codegen_flags: <defaults>
</compile_context>

<pallas_src>
import functools

import jax
import jax.numpy as jnp
from jax.experimental import pallas as pl
from jax.experimental.pallas import tpu as pltpu

LANE = 128
SUBLANE = 8
SOFTPLUS_THRESHOLD = 20.0  # torch.nn.Softplus(beta=1, threshold=20)


def _cdiv(a: int, b: int) -> int:
    return -(-a // b)


def _round_up(x: int, m: int) -> int:
    return ((x + m - 1) // m) * m


def _softplus(y):
    # torch semantics: softplus(x) = log(1 + exp(x)) for x <= 20, x otherwise.
    y_safe = jnp.minimum(y, SOFTPLUS_THRESHOLD)
    return jnp.where(y > SOFTPLUS_THRESHOLD, y, jnp.log1p(jnp.exp(y_safe)))


def _make_mlp_kernel(n_layers: int, n_out: int):
    """Fused MLP kernel: rest = (w0, b0, w1, b1, ..., o_ref)."""

    def kernel(x_ref, *rest):
        o_ref = rest[-1]
        h = x_ref[...].astype(jnp.float32)
        for i in range(n_layers):
            w = rest[2 * i][...]
            b = rest[2 * i + 1][...]          # (1, N) f32, broadcast over rows
            # bf16 path: cast activations to the weight dtype (no-op for f32),
            # accumulate on the MXU in f32, bias + softplus stay f32.
            h = jnp.dot(h.astype(w.dtype), w,
                        preferred_element_type=jnp.float32) + b
            if i < n_layers - 1:
                h = _softplus(h)
        # Only the real output lanes are stored; padded lanes never hit HBM.
        o_ref[...] = h[:, :n_out].astype(o_ref.dtype)

    return kernel


def init_network_params(key, n_in, n_neu, n_out, dtype=jnp.float32):
    """Unpadded params matching nn.Linear default init: U(-1/sqrt(fan_in), ...).

    Weights are stored transposed, (in_features, out_features), so the kernel
    hot path is x @ W + b.
    """
    dims = [n_in] + list(n_neu) + [n_out]
    params = []
    for i in range(len(dims) - 1):
        fan_in, fan_out = dims[i], dims[i + 1]
        key, kw, kb = jax.random.split(key, 3)
        bound = 1.0 / jnp.sqrt(jnp.asarray(fan_in, dtype))
        w_t = jax.random.uniform(kw, (fan_in, fan_out), dtype, -bound, bound)
        b = jax.random.uniform(kb, (1, fan_out), dtype, -bound, bound)
        params.append((w_t, b))
    return params


def pad_params_for_tpu(params, weight_dtype=jnp.float32):
    """Pad feature dims once at init:

      * layer 0: K (= n_in) left UNPADDED so the input x can be passed as-is;
        N padded to a multiple of 128 lanes.
      * later layers: K and N padded to multiples of 128; padded weight ROWS
        are zero, which neutralizes softplus(0)=ln2 in padded activation lanes.
      * last layer: padded the same way; the kernel slices the real n_out
        lanes before the store, so padded output never reaches HBM.

    Biases are always kept in float32 (bias add + softplus run in f32).
    """
    padded = []
    for i, (w_t, b) in enumerate(params):
        k, n = w_t.shape
        k_p = k if i == 0 else _round_up(k, LANE)
        n_p = _round_up(n, LANE)
        w_p = (jnp.zeros((k_p, n_p), weight_dtype)
               .at[:k, :n].set(w_t.astype(weight_dtype)))
        b_p = jnp.zeros((1, n_p), jnp.float32).at[:, :n].set(b.astype(jnp.float32))
        padded.append((w_p, b_p))
    return padded


def _resident_spec(block_shape, single_buffer: bool):
    """Weight/bias spec: constant index_map -> VMEM-resident across the grid.

    single_buffer=True requests pl.Buffered(1): a block that never changes
    does not need double buffering (halves its VMEM footprint, matters on
    v7x's 64 MiB VMEM).  Falls back to the default if unsupported.
    """
    index_map = lambda i: (0, 0)
    if single_buffer:
        try:
            return pl.BlockSpec(block_shape, index_map,
                                pipeline_mode=pl.Buffered(1))
        except Exception:  # older JAX without pipeline_mode / Buffered
            pass
    return pl.BlockSpec(block_shape, index_map)


def _choose_tile_m(m, n_in, padded_params, *, max_tile_m=1024,
                   vmem_budget_bytes=24 << 20):
    """Pick the batch tile.

    * sublane aligned (multiple of 8);
    * >= 2 grid steps whenever the batch allows, so the "parallel" grid axis
      gives v7x's second TensorCore work (v5e/v6e single-TC: unaffected);
    * capped by max_tile_m and a VMEM guard (double-buffered x/out tiles +
      widest f32 activation + resident weights must fit the scoped limit).
    """
    m8 = _round_up(max(m, 1), SUBLANE)
    tile = SUBLANE if m8 <= SUBLANE else _round_up(_cdiv(m8, 2), SUBLANE)
    tile = min(tile, max_tile_m)

    widths = [n_in] + [w.shape[1] for w, _ in padded_params]
    weight_bytes = sum(w.size * w.dtype.itemsize + 4 * b.size
                       for w, b in padded_params)

    def fits(t):
        act_bytes = 4 * t * (2 * widths[0] + 2 * widths[-1] + 2 * max(widths))
        return act_bytes + weight_bytes <= vmem_budget_bytes

    while tile > SUBLANE and not fits(tile):
        tile = _round_up(tile // 2, SUBLANE)
    return tile


def _mlp_pallas_call(x, padded_params, n_out, tile_m, single_buffer_weights):
    """One fused pallas_call over the whole MLP — no wrapper pad/slice."""
    m, n_in = x.shape
    n_layers = len(padded_params)
    grid = (_cdiv(m, tile_m),)

    in_specs = [pl.BlockSpec((tile_m, n_in), lambda i: (i, 0))]
    flat_args = [x]
    for w_p, b_p in padded_params:
        k_p, n_p = w_p.shape
        in_specs.append(_resident_spec((k_p, n_p), single_buffer_weights))
        in_specs.append(_resident_spec((1, n_p), single_buffer_weights))
        flat_args.append(w_p)
        flat_args.append(b_p)

    flops = sum(2 * m * w.shape[0] * w.shape[1] for w, _ in padded_params)
    transcendentals = sum(2 * m * w.shape[1] for w, _ in padded_params[:-1])
    bytes_accessed = (4 * (x.size + m * n_out)
                      + sum(w.size * w.dtype.itemsize + 4 * b.size
                            for w, b in padded_params))

    return pl.pallas_call(
        _make_mlp_kernel(n_layers, n_out),
        out_shape=jax.ShapeDtypeStruct((m, n_out), x.dtype),
        grid=grid,
        in_specs=in_specs,
        out_specs=pl.BlockSpec((tile_m, n_out), lambda i: (i, 0)),
        compiler_params=pltpu.CompilerParams(
            dimension_semantics=("parallel",),   # batch tiles across TCs (v7x)
            vmem_limit_bytes=32 << 20,           # safe on v5e/v6e/v7x
        ),
        cost_estimate=pl.CostEstimate(
            flops=int(flops),
            transcendentals=int(transcendentals),
            bytes_accessed=int(bytes_accessed),
        ),
    )(*flat_args)


def network_forward(padded_params, x, n_out, *, max_tile_m=1024,
                    single_buffer_weights=True):
    """Reproduces Network.forward with a single fused Pallas kernel.

    x: (batch, n_in) unpadded; padded_params from pad_params_for_tpu.
    No HBM padding or slicing: the kernel reads x as-is and writes exactly
    (batch, n_out).
    """
    m, n_in = x.shape
    tile_m = _choose_tile_m(m, n_in, padded_params, max_tile_m=max_tile_m)
    return _mlp_pallas_call(x, padded_params, n_out, tile_m,
                            single_buffer_weights)


def network_forward_ref(params, x):
    """Pure-JAX reference on the unpadded f32 params."""
    n_layers = len(params)
    for i, (w_t, b) in enumerate(params):
        x = x @ w_t + b
        if i < n_layers - 1:
            x = _softplus(x)
    return x


if __name__ == "__main__":
    key = jax.random.PRNGKey(0)

    # Small shapes consistent with the module: n_in inputs, two hidden layers,
    # n_out outputs.
    batch, n_in, n_neu, n_out = 8, 16, [32, 32], 4

    key, kx = jax.random.split(key)
    x = jax.random.normal(kx, (batch, n_in), jnp.float32)

    params = init_network_params(key, n_in, n_neu, n_out)
    ref = network_forward_ref(params, x)

    # ---- f32 path (bit-comparable to the reference within 1e-5) ----
    padded_f32 = pad_params_for_tpu(params)          # pad once at init
    fwd = jax.jit(functools.partial(network_forward, n_out=n_out))
    try:
        out = jax.block_until_ready(fwd(padded_f32, x))
    except Exception:
        # pipeline_mode=pl.Buffered(1) unsupported on this JAX build: fall
        # back to default double-buffered resident weights.
        fwd = jax.jit(functools.partial(network_forward, n_out=n_out,
                                        single_buffer_weights=False))
        out = jax.block_until_ready(fwd(padded_f32, x))

    assert out.shape == (batch, n_out), out.shape
    assert jnp.allclose(out, ref, atol=1e-5, rtol=1e-5), "f32 mismatch vs reference"

    # ---- bf16 weight/activation path (MXU-native; f32 accumulate/bias/softplus) ----
    padded_bf16 = pad_params_for_tpu(params, weight_dtype=jnp.bfloat16)
    out_bf16 = jax.block_until_ready(fwd(padded_bf16, x))
    assert out_bf16.shape == (batch, n_out), out_bf16.shape
    assert jnp.allclose(out_bf16, ref, atol=5e-2, rtol=5e-2), "bf16 path diverged"

    print("KERNEL_OK")
</pallas_src>

<mosaic_0001>
module attributes {stable_mosaic.version = 11 : i64} {
  func.func @kernel(%arg0: i32, %arg1: memref<8x16xf32, #tpu.memory_space<vmem>>, %arg2: memref<16x128xf32, #tpu.memory_space<vmem>>, %arg3: memref<1x128xf32, #tpu.memory_space<vmem>>, %arg4: memref<128x128xf32, #tpu.memory_space<vmem>>, %arg5: memref<1x128xf32, #tpu.memory_space<vmem>>, %arg6: memref<128x128xf32, #tpu.memory_space<vmem>>, %arg7: memref<1x128xf32, #tpu.memory_space<vmem>>, %arg8: memref<8x4xf32, #tpu.memory_space<vmem>>) attributes {dimension_semantics = [#tpu.dimension_semantics<parallel>], iteration_bounds = array<i64: 1>, scalar_prefetch = 0 : i64, scratch_operands = 0 : i64, tpu.core_type = #tpu.core_type<tc>, window_params = [{transform_indices = @transform_0, window_bounds = array<i64: 8, 16>}, {pipeline_mode = #tpu.pipeline_mode<synchronous>, transform_indices = @transform_1, window_bounds = array<i64: 16, 128>}, {pipeline_mode = #tpu.pipeline_mode<synchronous>, transform_indices = @transform_2, window_bounds = array<i64: 1, 128>}, {pipeline_mode = #tpu.pipeline_mode<synchronous>, transform_indices = @transform_3, window_bounds = array<i64: 128, 128>}, {pipeline_mode = #tpu.pipeline_mode<synchronous>, transform_indices = @transform_4, window_bounds = array<i64: 1, 128>}, {pipeline_mode = #tpu.pipeline_mode<synchronous>, transform_indices = @transform_5, window_bounds = array<i64: 128, 128>}, {pipeline_mode = #tpu.pipeline_mode<synchronous>, transform_indices = @transform_6, window_bounds = array<i64: 1, 128>}, {transform_indices = @transform_7, window_bounds = array<i64: 8, 4>}]} {
    %c0 = arith.constant 0 : index
    %c0_0 = arith.constant 0 : index
    %0 = vector.load %arg1[%c0, %c0_0] : memref<8x16xf32, #tpu.memory_space<vmem>>, vector<8x16xf32>
    %c0_1 = arith.constant 0 : index
    %c0_2 = arith.constant 0 : index
    %1 = vector.load %arg2[%c0_1, %c0_2] : memref<16x128xf32, #tpu.memory_space<vmem>>, vector<16x128xf32>
    %c0_3 = arith.constant 0 : index
    %c0_4 = arith.constant 0 : index
    %2 = vector.load %arg3[%c0_3, %c0_4] : memref<1x128xf32, #tpu.memory_space<vmem>>, vector<1x128xf32>
    %cst = arith.constant dense<0.000000e+00> : vector<8x128xf32>
    %3 = tpu.matmul %0, %1, %cst {dimension_numbers = #tpu.dot_dimension_numbers<[1], [0], [0], [1], [0, 0, 1, 1], [], []>} : vector<8x16xf32>, vector<16x128xf32>, vector<8x128xf32> -> vector<8x128xf32>
    %4 = vector.broadcast %2 : vector<1x128xf32> to vector<8x128xf32>
    %5 = arith.addf %3, %4 : vector<8x128xf32>
    %cst_5 = arith.constant 2.000000e+01 : f32
    %6 = vector.broadcast %cst_5 : f32 to vector<8x128xf32>
    %7 = arith.minimumf %5, %6 : vector<8x128xf32>
    %cst_6 = arith.constant 2.000000e+01 : f32
    %8 = vector.broadcast %cst_6 : f32 to vector<8x128xf32>
    %9 = arith.cmpf ogt, %5, %8 : vector<8x128xf32>
    %10 = math.exp %7 : vector<8x128xf32>
    %11 = math.log1p %10 : vector<8x128xf32>
    %12 = arith.select %9, %5, %11 : vector<8x128xi1>, vector<8x128xf32>
    %c0_7 = arith.constant 0 : index
    %c0_8 = arith.constant 0 : index
    %13 = vector.load %arg4[%c0_7, %c0_8] : memref<128x128xf32, #tpu.memory_space<vmem>>, vector<128x128xf32>
    %c0_9 = arith.constant 0 : index
    %c0_10 = arith.constant 0 : index
    %14 = vector.load %arg5[%c0_9, %c0_10] : memref<1x128xf32, #tpu.memory_space<vmem>>, vector<1x128xf32>
    %cst_11 = arith.constant dense<0.000000e+00> : vector<8x128xf32>
    %15 = tpu.matmul %12, %13, %cst_11 {dimension_numbers = #tpu.dot_dimension_numbers<[1], [0], [0], [1], [0, 0, 1, 1], [], []>} : vector<8x128xf32>, vector<128x128xf32>, vector<8x128xf32> -> vector<8x128xf32>
    %16 = vector.broadcast %14 : vector<1x128xf32> to vector<8x128xf32>
    %17 = arith.addf %15, %16 : vector<8x128xf32>
    %cst_12 = arith.constant 2.000000e+01 : f32
    %18 = vector.broadcast %cst_12 : f32 to vector<8x128xf32>
    %19 = arith.minimumf %17, %18 : vector<8x128xf32>
    %cst_13 = arith.constant 2.000000e+01 : f32
    %20 = vector.broadcast %cst_13 : f32 to vector<8x128xf32>
    %21 = arith.cmpf ogt, %17, %20 : vector<8x128xf32>
    %22 = math.exp %19 : vector<8x128xf32>
    %23 = math.log1p %22 : vector<8x128xf32>
    %24 = arith.select %21, %17, %23 : vector<8x128xi1>, vector<8x128xf32>
    %c0_14 = arith.constant 0 : index
    %c0_15 = arith.constant 0 : index
    %25 = vector.load %arg6[%c0_14, %c0_15] : memref<128x128xf32, #tpu.memory_space<vmem>>, vector<128x128xf32>
    %c0_16 = arith.constant 0 : index
    %c0_17 = arith.constant 0 : index
    %26 = vector.load %arg7[%c0_16, %c0_17] : memref<1x128xf32, #tpu.memory_space<vmem>>, vector<1x128xf32>
    %cst_18 = arith.constant dense<0.000000e+00> : vector<8x128xf32>
    %27 = tpu.matmul %24, %25, %cst_18 {dimension_numbers = #tpu.dot_dimension_numbers<[1], [0], [0], [1], [0, 0, 1, 1], [], []>} : vector<8x128xf32>, vector<128x128xf32>, vector<8x128xf32> -> vector<8x128xf32>
    %28 = vector.broadcast %26 : vector<1x128xf32> to vector<8x128xf32>
    %29 = arith.addf %27, %28 : vector<8x128xf32>
    %30 = vector.extract_strided_slice %29 {offsets = [0, 0], sizes = [8, 4], strides = [1, 1]} : vector<8x128xf32> to vector<8x4xf32>
    %c0_19 = arith.constant 0 : index
    %c0_20 = arith.constant 0 : index
    %31 = vector.load %arg8[%c0_19, %c0_20] : memref<8x4xf32, #tpu.memory_space<vmem>>, vector<8x4xf32>
    tpu.vector_store %arg8[%c0_19, %c0_20], %30 {strides = array<i32>} : memref<8x4xf32, #tpu.memory_space<vmem>>, vector<8x4xf32>,
    return
  }
  func.func @transform_0(%arg0: i32) -> (i32, i32) {
    %c0_i32 = arith.constant 0 : i32
    %c0_i32_0 = arith.constant 0 : i32
    return %arg0, %c0_i32 : i32, i32
  }
  func.func @transform_1(%arg0: i32) -> (i32, i32) {
    %c0_i32 = arith.constant 0 : i32
    %c0_i32_0 = arith.constant 0 : i32
    %c0_i32_1 = arith.constant 0 : i32
    return %c0_i32, %c0_i32_0 : i32, i32
  }
  func.func @transform_2(%arg0: i32) -> (i32, i32) {
    %c0_i32 = arith.constant 0 : i32
    %c0_i32_0 = arith.constant 0 : i32
    %c0_i32_1 = arith.constant 0 : i32
    return %c0_i32, %c0_i32_0 : i32, i32
  }
  func.func @transform_3(%arg0: i32) -> (i32, i32) {
    %c0_i32 = arith.constant 0 : i32
    %c0_i32_0 = arith.constant 0 : i32
    %c0_i32_1 = arith.constant 0 : i32
    return %c0_i32, %c0_i32_0 : i32, i32
  }
  func.func @transform_4(%arg0: i32) -> (i32, i32) {
    %c0_i32 = arith.constant 0 : i32
    %c0_i32_0 = arith.constant 0 : i32
    %c0_i32_1 = arith.constant 0 : i32
    return %c0_i32, %c0_i32_0 : i32, i32
  }
  func.func @transform_5(%arg0: i32) -> (i32, i32) {
    %c0_i32 = arith.constant 0 : i32
    %c0_i32_0 = arith.constant 0 : i32
    %c0_i32_1 = arith.constant 0 : i32
    return %c0_i32, %c0_i32_0 : i32, i32
  }
  func.func @transform_6(%arg0: i32) -> (i32, i32) {
    %c0_i32 = arith.constant 0 : i32
    %c0_i32_0 = arith.constant 0 : i32
    %c0_i32_1 = arith.constant 0 : i32
    return %c0_i32, %c0_i32_0 : i32, i32
  }
  func.func @transform_7(%arg0: i32) -> (i32, i32) {
    %c0_i32 = arith.constant 0 : i32
    %c0_i32_0 = arith.constant 0 : i32
    return %arg0, %c0_i32 : i32, i32
  }
}

module attributes {stable_mosaic.version = 11 : i64} {
  func.func @kernel(%arg0: i32, %arg1: memref<8x16xf32, #tpu.memory_space<vmem>>, %arg2: memref<16x128xf32, #tpu.memory_space<vmem>>, %arg3: memref<1x128xf32, #tpu.memory_space<vmem>>, %arg4: memref<128x128xf32, #tpu.memory_space<vmem>>, %arg5: memref<1x128xf32, #tpu.memory_space<vmem>>, %arg6: memref<128x128xf32, #tpu.memory_space<vmem>>, %arg7: memref<1x128xf32, #tpu.memory_space<vmem>>, %arg8: memref<8x4xf32, #tpu.memory_space<vmem>>) attributes {dimension_semantics = [#tpu.dimension_semantics<parallel>], iteration_bounds = array<i64: 1>, scalar_prefetch = 0 : i64, scratch_operands = 0 : i64, tpu.core_type = #tpu.core_type<tc>, window_params = [{transform_indices = @transform_0, window_bounds = array<i64: 8, 16>}, {pipeline_mode = #tpu.pipeline_mode<synchronous>, transform_indices = @transform_1, window_bounds = array<i64: 16, 128>}, {pipeline_mode = #tpu.pipeline_mode<synchronous>, transform_indices = @transform_2, window_bounds = array<i64: 1, 128>}, {pipeline_mode = #tpu.pipeline_mode<synchronous>, transform_indices = @transform_3, window_bounds = array<i64: 128, 128>}, {pipeline_mode = #tpu.pipeline_mode<synchronous>, transform_indices = @transform_4, window_bounds = array<i64: 1, 128>}, {pipeline_mode = #tpu.pipeline_mode<synchronous>, transform_indices = @transform_5, window_bounds = array<i64: 128, 128>}, {pipeline_mode = #tpu.pipeline_mode<synchronous>, transform_indices = @transform_6, window_bounds = array<i64: 1, 128>}, {transform_indices = @transform_7, window_bounds = array<i64: 8, 4>}]} {
    %c0 = arith.constant 0 : index
    %c0_0 = arith.constant 0 : index
    %0 = vector.load %arg1[%c0, %c0_0] : memref<8x16xf32, #tpu.memory_space<vmem>>, vector<8x16xf32>
    %c0_1 = arith.constant 0 : index
    %c0_2 = arith.constant 0 : index
    %1 = vector.load %arg2[%c0_1, %c0_2] : memref<16x128xf32, #tpu.memory_space<vmem>>, vector<16x128xf32>
    %c0_3 = arith.constant 0 : index
    %c0_4 = arith.constant 0 : index
    %2 = vector.load %arg3[%c0_3, %c0_4] : memref<1x128xf32, #tpu.memory_space<vmem>>, vector<1x128xf32>
    %cst = arith.constant dense<0.000000e+00> : vector<8x128xf32>
    %3 = tpu.matmul %0, %1, %cst {dimension_numbers = #tpu.dot_dimension_numbers<[1], [0], [0], [1], [0, 0, 1, 1], [], []>} : vector<8x16xf32>, vector<16x128xf32>, vector<8x128xf32> -> vector<8x128xf32>
    %4 = vector.broadcast %2 : vector<1x128xf32> to vector<8x128xf32>
    %5 = arith.addf %3, %4 : vector<8x128xf32>
    %cst_5 = arith.constant 2.000000e+01 : f32
    %6 = vector.broadcast %cst_5 : f32 to vector<8x128xf32>
    %7 = arith.minimumf %5, %6 : vector<8x128xf32>
    %cst_6 = arith.constant 2.000000e+01 : f32
    %8 = vector.broadcast %cst_6 : f32 to vector<8x128xf32>
    %9 = arith.cmpf ogt, %5, %8 : vector<8x128xf32>
    %10 = math.exp %7 : vector<8x128xf32>
    %11 = math.log1p %10 : vector<8x128xf32>
    %12 = arith.select %9, %5, %11 : vector<8x128xi1>, vector<8x128xf32>
    %c0_7 = arith.constant 0 : index
    %c0_8 = arith.constant 0 : index
    %13 = vector.load %arg4[%c0_7, %c0_8] : memref<128x128xf32, #tpu.memory_space<vmem>>, vector<128x128xf32>
    %c0_9 = arith.constant 0 : index
    %c0_10 = arith.constant 0 : index
    %14 = vector.load %arg5[%c0_9, %c0_10] : memref<1x128xf32, #tpu.memory_space<vmem>>, vector<1x128xf32>
    %cst_11 = arith.constant dense<0.000000e+00> : vector<8x128xf32>
    %15 = tpu.matmul %12, %13, %cst_11 {dimension_numbers = #tpu.dot_dimension_numbers<[1], [0], [0], [1], [0, 0, 1, 1], [], []>} : vector<8x128xf32>, vector<128x128xf32>, vector<8x128xf32> -> vector<8x128xf32>
    %16 = vector.broadcast %14 : vector<1x128xf32> to vector<8x128xf32>
    %17 = arith.addf %15, %16 : vector<8x128xf32>
    %cst_12 = arith.constant 2.000000e+01 : f32
    %18 = vector.broadcast %cst_12 : f32 to vector<8x128xf32>
    %19 = arith.minimumf %17, %18 : vector<8x128xf32>
    %cst_13 = arith.constant 2.000000e+01 : f32
    %20 = vector.broadcast %cst_13 : f32 to vector<8x128xf32>
    %21 = arith.cmpf ogt, %17, %20 : vector<8x128xf32>
    %22 = math.exp %19 : vector<8x128xf32>
    %23 = math.log1p %22 : vector<8x128xf32>
    %24 = arith.select %21, %17, %23 : vector<8x128xi1>, vector<8x128xf32>
    %c0_14 = arith.constant 0 : index
    %c0_15 = arith.constant 0 : index
    %25 = vector.load %arg6[%c0_14, %c0_15] : memref<128x128xf32, #tpu.memory_space<vmem>>, vector<128x128xf32>
    %c0_16 = arith.constant 0 : index
    %c0_17 = arith.constant 0 : index
    %26 = vector.load %arg7[%c0_16, %c0_17] : memref<1x128xf32, #tpu.memory_space<vmem>>, vector<1x128xf32>
    %cst_18 = arith.constant dense<0.000000e+00> : vector<8x128xf32>
    %27 = tpu.matmul %24, %25, %cst_18 {dimension_numbers = #tpu.dot_dimension_numbers<[1], [0], [0], [1], [0, 0, 1, 1], [], []>} : vector<8x128xf32>, vector<128x128xf32>, vector<8x128xf32> -> vector<8x128xf32>
    %28 = vector.broadcast %26 : vector<1x128xf32> to vector<8x128xf32>
    %29 = arith.addf %27, %28 : vector<8x128xf32>
    %30 = vector.extract_strided_slice %29 {offsets = [0, 0], sizes = [8, 4], strides = [1, 1]} : vector<8x128xf32> to vector<8x4xf32>
    %c0_19 = arith.constant 0 : index
    %c0_20 = arith.constant 0 : index
    %31 = vector.load %arg8[%c0_19, %c0_20] : memref<8x4xf32, #tpu.memory_space<vmem>>, vector<8x4xf32>
    tpu.vector_store %arg8[%c0_19, %c0_20], %30 {strides = array<i32>} : memref<8x4xf32, #tpu.memory_space<vmem>>, vector<8x4xf32>,
    return
  }
  func.func @transform_0(%arg0: i32) -> (i32, i32) {
    %c0_i32 = arith.constant 0 : i32
    %c0_i32_0 = arith.constant 0 : i32
    return %arg0, %c0_i32 : i32, i32
  }
  func.func @transform_1(%arg0: i32) -> (i32, i32) {
    %c0_i32 = arith.constant 0 : i32
    %c0_i32_0 = arith.constant 0 : i32
    %c0_i32_1 = arith.constant 0 : i32
    return %c0_i32, %c0_i32_0 : i32, i32
  }
  func.func @transform_2(%arg0: i32) -> (i32, i32) {
    %c0_i32 = arith.constant 0 : i32
    %c0_i32_0 = arith.constant 0 : i32
    %c0_i32_1 = arith.constant 0 : i32
    return %c0_i32, %c0_i32_0 : i32, i32
  }
  func.func @transform_3(%arg0: i32) -> (i32, i32) {
    %c0_i32 = arith.constant 0 : i32
    %c0_i32_0 = arith.constant 0 : i32
    %c0_i32_1 = arith.constant 0 : i32
    return %c0_i32, %c0_i32_0 : i32, i32
  }
  func.func @transform_4(%arg0: i32) -> (i32, i32) {
    %c0_i32 = arith.constant 0 : i32
    %c0_i32_0 = arith.constant 0 : i32
    %c0_i32_1 = arith.constant 0 : i32
    return %c0_i32, %c0_i32_0 : i32, i32
  }
  func.func @transform_5(%arg0: i32) -> (i32, i32) {
    %c0_i32 = arith.constant 0 : i32
    %c0_i32_0 = arith.constant 0 : i32
    %c0_i32_1 = arith.constant 0 : i32
    return %c0_i32, %c0_i32_0 : i32, i32
  }
  func.func @transform_6(%arg0: i32) -> (i32, i32) {
    %c0_i32 = arith.constant 0 : i32
    %c0_i32_0 = arith.constant 0 : i32
    %c0_i32_1 = arith.constant 0 : i32
    return %c0_i32, %c0_i32_0 : i32, i32
  }
  func.func @transform_7(%arg0: i32) -> (i32, i32) {
    %c0_i32 = arith.constant 0 : i32
    %c0_i32_0 = arith.constant 0 : i32
    return %arg0, %c0_i32 : i32, i32
  }
}

</mosaic_0001>

<bundles_post_ra>
// kernel: network_forward.1
= control target key start
LH: loop header
LB: loop body
LE: loop exit
PB: predicated region body
PF: predicated region fallthrough
CT: control target
= control target key end

     0   :  { %12 = vsyncpa [#allocation3], 0  ;;  %s715_s0 = inlined_call_operand.vmem [shape: f32[8,16], index: 0, kind: input, shape index: {}]   ;;  %s716_s1 = inlined_call_operand.hbm [shape: f32[16,128], index: 1, kind: input, shape index: {}]   ;;  %s717_s2 = inlined_call_operand.vmem [shape: f32[1,128], index: 2, kind: input, shape index: {}]   ;;  %s718_s3 = inlined_call_operand.hbm [shape: f32[128,128], index: 3, kind: input, shape index: {}]   ;;  %s719_s4 = inlined_call_operand.vmem [shape: f32[1,128], index: 4, kind: input, shape index: {}]   ;;  %s720_s5 = inlined_call_operand.hbm [shape: f32[128,128], index: 5, kind: input, shape index: {}]   ;;  %s721_s6 = inlined_call_operand.hbm [shape: f32[1,128], index: 6, kind: input, shape index: {}]   ;;  %s722_s7 = inlined_call_operand.vmem [shape: f32[8,4], index: 7, kind: output, shape index: {}]  }
   0x1   :  { %13 = vsyncpa [#allocation5], 0 }
   0x2   :  { %14 = vsyncpa [#allocation8], 0  ;;  %s606_s24 = smov [#allocation4]   ;;  %s607_s26 = smov [#allocation2]  }
   0x3   :  { %s36_s25 = sshll.u32 %s606_s24, 4  ;;  %s22_s27 = sshll.u32 %s607_s26, 4  ;;  %s37_s25 = int_to_ptr.vmem [resolvable:$true] %s36_s25  ;;  %s23_s27 = int_to_ptr.vmem [resolvable:$true] %s22_s27 }
   0x4   :  { %s528_s28 = scalar_lea.vmem %s37_s25, 2048  ;;  %p533_p1 = scmp.lt.s32.totalorder %s37_s25, %s37_s25 }
   0x5   :  { %p529_p0 = scmp.ne.s32.totalorder %s37_s25, %s528_s28  ;;  %p534_p2 = scmp.lt.s32.totalorder %s528_s28, %s528_s28 }
   0x7   :  { %p535_p3 = por %p534_p2, %p533_p1 }
   0x9   :  { %p536_p4 = pnand %p535_p3, %p529_p0 }
   0xb   :  { %539 = shalt.err (!%p536_p4)
}
   0xc   :  { %s608_s29 = smov 128   ;;  %s609_s30 = smov 8  }
   0xd   :  { %42 = dma.hbm_to_vmem [thread:$0]  %s718_s3, 2048, %s37_s25, [#allocation5], %s608_s29, %s608_s29, %s609_s30  }
   0xe   :  { %s548_s10 = scalar_lea.vmem %s23_s27, 256  ;;  %p553_p6 = scmp.lt.s32.totalorder %s23_s27, %s23_s27 }
   0xf   :  { %p549_p5 = scmp.ne.s32.totalorder %s23_s27, %s548_s10  ;;  %p554_p7 = scmp.lt.s32.totalorder %s548_s10, %s548_s10 }
  0x11   :  { %p555_p8 = por %p554_p7, %p553_p6 }
  0x13   :  { %p556_p9 = pnand %p555_p8, %p549_p5 }
  0x15   :  { %559 = shalt.err (!%p556_p9)
}
  0x16   :  { %28 = dma.hbm_to_vmem [thread:$0]  %s716_s1, 256, %s23_s27, [#allocation3], %s608_s29, %s608_s29, %s609_s30  }
  0x17   :  { %s610_s13 = smov [#allocation6]   ;;  %s611_s15 = smov [#allocation7]  }
  0x18   :  { %s50_s14 = sshll.u32 %s610_s13, 4  ;;  %s63_s16 = sshll.u32 %s611_s15, 4  ;;  %s51_s14 = int_to_ptr.vmem [resolvable:$true] %s50_s14  ;;  %s64_s16 = int_to_ptr.vmem [resolvable:$true] %s63_s16 }
  0x19   :  { %s568_s17 = scalar_lea.vmem %s51_s14, 2048  ;;  %p573_p11 = scmp.lt.s32.totalorder %s51_s14, %s51_s14 }
  0x1a   :  { %p569_p10 = scmp.ne.s32.totalorder %s51_s14, %s568_s17  ;;  %p574_p12 = scmp.lt.s32.totalorder %s568_s17, %s568_s17 }
  0x1c   :  { %p575_p13 = por %p574_p12, %p573_p11 }
  0x1e   :  { %p576_p0 = pnand %p575_p13, %p569_p10 }
  0x20   :  { %579 = shalt.err (!%p576_p0)
}
  0x21   :  { %56 = dma.hbm_to_vmem [thread:$0]  %s720_s5, 2048, %s51_s14, [#allocation5], %s608_s29, %s608_s29, %s609_s30  }
  0x22   :  { %s588_s19 = scalar_lea.vmem %s64_s16, 16  ;;  %s592_s1 = scalar_lea.vmem %s64_s16, 32 }
  0x23   :  { %p589_p1 = scmp.ne.s32.totalorder %s64_s16, %s588_s19  ;;  %p593_p2 = scmp.lt.s32.totalorder %s64_s16, %s64_s16 }
  0x24   :  { %p594_p3 = scmp.lt.s32.totalorder %s592_s1, %s588_s19 }
  0x26   :  { %p595_p4 = por %p594_p3, %p593_p2 }
  0x28   :  { %p596_p5 = pnand %p595_p4, %p589_p1 }
  0x2a   :  { %599 = shalt.err (!%p596_p5)
}
  0x2b   :  { %66 = dma.hbm_to_vmem [thread:$0]  %s721_s6, 16, %s64_s16, [#allocation8]  }
  0x2c   :  { %600 = dma.done.wait [#allocation3], 256  }
  0x2d   :  { %601 = vsyncadd [#allocation3], 4294967040 }
  0x2e   :  { %602 = dma.done.wait [#allocation5], 4096  }
  0x2f   :  { %603 = vsyncadd [#allocation5], 4294963200 }
  0x30   :  { %604 = dma.done.wait [#allocation8], 16  }
  0x31   :  { %605 = vsyncadd [#allocation8], 4294967280  ;;  %v612_v0 = vmov 0.0   ;;  %vm613_vm0 = vmmov 0   ;;  %v81_v1 = vld [vmem:[#allocation2 + $0x8] sm:$0xff]  ;;  %v80_v2 = vld [vmem:[#allocation2] sm:$0xff] }
  0x32   :  { %427 = vmatprep.subr.mxu0 %v612_v0  ;;  %431 = vmatprep.mubr.msk.f32.mxu0 %vm613_vm0, %v612_v0  ;;  %v79_v3 = vld [vmem:[%s715_s0] sm:$0xff]  ;;  %vm89_vm1 = vcmask 130048   ;;  %v192_v4 = vld [vmem:[#allocation4 + $0x78] sm:$0xff]  ;;  %v190_v6 = vld [vmem:[#allocation4 + $0x68] sm:$0xff]  ;;  %vm377_vm6 = vcmask 31744  }
  0x33   :  { %434 = vmatprep.subr.mxu1 %v612_v0  ;;  %466 = vmatprep.mubr.msk.f32.mxu1 %vm613_vm0, %v612_v0  ;;  %v191_v5 = vld [vmem:[#allocation4 + $0x70] sm:$0xff]  ;;  %v189_v7 = vld [vmem:[#allocation4 + $0x60] sm:$0xff]  ;;  %v188_v8 = vld [vmem:[#allocation4 + $0x58] sm:$0xff] }
  0x34   :  { %428 = vmatpush3.msra.mxu0 %v81_v1  ;;  %435 = vmatpush3.msra.mxu1 %v192_v4  ;;  %v187_v9 = vld [vmem:[#allocation4 + $0x50] sm:$0xff]  ;;  %v186_v10 = vld [vmem:[#allocation4 + $0x48] sm:$0xff]  ;;  %v185_v11 = vld [vmem:[#allocation4 + $0x40] sm:$0xff] }
  0x35   :  { %429 = vmatprep.subr.mxu0 %v612_v0  ;;  %436 = vmatprep.subr.mxu1 %v612_v0  ;;  %v184_v12 = vld [vmem:[#allocation4 + $0x38] sm:$0xff]  ;;  %v183_v13 = vld [vmem:[#allocation4 + $0x30] sm:$0xff]  ;;  %v182_v14 = vld [vmem:[#allocation4 + $0x28] sm:$0xff] }
  0x36   :  { %430 = vmatpush3.msra.mxu0 %v80_v2  ;;  %437 = vmatpush3.msra.mxu1 %v191_v5  ;;  %v181_v15 = vld [vmem:[#allocation4 + $0x20] sm:$0xff]  ;;  %v180_v16 = vld [vmem:[#allocation4 + $0x18] sm:$0xff]  ;;  %v179_v17 = vld [vmem:[#allocation4 + $0x10] sm:$0xff] }
  0x37   :  { %432 = vmatmul.mubr.msk.f32.vlgmr.msra.gmra.mxu0 %vm89_vm1, %v79_v3  ;;  %469 = vmatprep.subr.mxu0 %v612_v0  ;;  %v178_v18 = vld [vmem:[#allocation4 + $0x8] sm:$0xff]  ;;  %v177_v19 = vld [vmem:[#allocation4] sm:$0xff]  ;;  %v386_v20 = vld [vmem:[%s717_s2] ss:$0 sm:$0xff] }
  0x38   :  { %501 = vmatprep.mubr.msk.f32.mxu0 %vm613_vm0, %v612_v0  ;;  %438 = vmatprep.subr.mxu1 %v612_v0  ;;  %v299_v36 = vld [vmem:[#allocation6 + $0x78] sm:$0xff]  ;;  %v298_v37 = vld [vmem:[#allocation6 + $0x70] sm:$0xff]  ;;  %v297_v38 = vld [vmem:[#allocation6 + $0x68] sm:$0xff] }
  0x39   :  { %439 = vmatpush3.msra.mxu1 %v190_v6  ;;  %470 = vmatpush3.msra.mxu0 %v299_v36  ;;  %v296_v39 = vld [vmem:[#allocation6 + $0x60] sm:$0xff]  ;;  %v295_v40 = vld [vmem:[#allocation6 + $0x58] sm:$0xff]  ;;  %v294_v41 = vld [vmem:[#allocation6 + $0x50] sm:$0xff] }
  0x3a   :  { %440 = vmatprep.subr.mxu1 %v612_v0  ;;  %471 = vmatprep.subr.mxu0 %v612_v0  ;;  %v293_v42 = vld [vmem:[#allocation6 + $0x48] sm:$0xff]  ;;  %v292_v43 = vld [vmem:[#allocation6 + $0x40] sm:$0xff]  ;;  %v291_v44 = vld [vmem:[#allocation6 + $0x38] sm:$0xff] }
  0x3b   :  { %441 = vmatpush3.msra.mxu1 %v189_v7  ;;  %472 = vmatpush3.msra.mxu0 %v298_v37  ;;  %v290_v45 = vld [vmem:[#allocation6 + $0x30] sm:$0xff]  ;;  %v289_v46 = vld [vmem:[#allocation6 + $0x28] sm:$0xff]  ;;  %v288_v47 = vld [vmem:[#allocation6 + $0x20] sm:$0xff] }
  0x3c   :  { %442 = vmatprep.subr.mxu1 %v612_v0  ;;  %473 = vmatprep.subr.mxu0 %v612_v0  ;;  %v287_v48 = vld [vmem:[#allocation6 + $0x18] sm:$0xff]  ;;  %v286_v49 = vld [vmem:[#allocation6 + $0x10] sm:$0xff]  ;;  %v285_v50 = vld [vmem:[#allocation6 + $0x8] sm:$0xff] }
  0x3d   :  { %443 = vmatpush3.msra.mxu1 %v188_v8  ;;  %474 = vmatpush3.msra.mxu0 %v297_v38  ;;  %v284_v51 = vld [vmem:[#allocation6] sm:$0xff]  ;;  %v388_v52 = vld [vmem:[%s719_s4] ss:$0 sm:$0xff] }
  0x3e   :  { %444 = vmatprep.subr.mxu1 %v612_v0  ;;  %475 = vmatprep.subr.mxu0 %v612_v0  ;;  %v389_v4 = vld [vmem:[#allocation7] ss:$0 sm:$0xff] }
  0x3f   :  { %445 = vmatpush3.msra.mxu1 %v187_v9  ;;  %476 = vmatpush3.msra.mxu0 %v296_v39 }
  0x40   :  { %446 = vmatprep.subr.mxu1 %v612_v0  ;;  %477 = vmatprep.subr.mxu0 %v612_v0 }
  0x41   :  { %447 = vmatpush3.msra.mxu1 %v186_v10  ;;  %478 = vmatpush3.msra.mxu0 %v295_v40 }
  0x42   :  { %448 = vmatprep.subr.mxu1 %v612_v0  ;;  %479 = vmatprep.subr.mxu0 %v612_v0 }
  0x43   :  { %449 = vmatpush3.msra.mxu1 %v185_v11  ;;  %480 = vmatpush3.msra.mxu0 %v294_v41 }
  0x44   :  { %450 = vmatprep.subr.mxu1 %v612_v0  ;;  %481 = vmatprep.subr.mxu0 %v612_v0 }
  0x45   :  { %451 = vmatpush3.msra.mxu1 %v184_v12  ;;  %482 = vmatpush3.msra.mxu0 %v293_v42 }
  0x46   :  { %452 = vmatprep.subr.mxu1 %v612_v0  ;;  %483 = vmatprep.subr.mxu0 %v612_v0 }
  0x47   :  { %453 = vmatpush3.msra.mxu1 %v183_v13  ;;  %484 = vmatpush3.msra.mxu0 %v292_v43 }
  0x48   :  { %454 = vmatprep.subr.mxu1 %v612_v0  ;;  %485 = vmatprep.subr.mxu0 %v612_v0 }
  0x49   :  { %455 = vmatpush3.msra.mxu1 %v182_v14  ;;  %486 = vmatpush3.msra.mxu0 %v291_v44 }
  0x4a   :  { %456 = vmatprep.subr.mxu1 %v612_v0  ;;  %487 = vmatprep.subr.mxu0 %v612_v0 }
  0x4b   :  { %457 = vmatpush3.msra.mxu1 %v181_v15  ;;  %488 = vmatpush3.msra.mxu0 %v290_v45 }
  0x4c   :  { %458 = vmatprep.subr.mxu1 %v612_v0  ;;  %489 = vmatprep.subr.mxu0 %v612_v0 }
  0x4d   :  { %459 = vmatpush3.msra.mxu1 %v180_v16  ;;  %490 = vmatpush3.msra.mxu0 %v289_v46 }
  0x4e   :  { %460 = vmatprep.subr.mxu1 %v612_v0  ;;  %491 = vmatprep.subr.mxu0 %v612_v0 }
  0x4f   :  { %461 = vmatpush3.msra.mxu1 %v179_v17  ;;  %492 = vmatpush3.msra.mxu0 %v288_v47 }
  0x50   :  { %462 = vmatprep.subr.mxu1 %v612_v0  ;;  %493 = vmatprep.subr.mxu0 %v612_v0 }
  0x51   :  { %463 = vmatpush3.msra.mxu1 %v178_v18  ;;  %494 = vmatpush3.msra.mxu0 %v287_v48 }
  0x52   :  { %464 = vmatprep.subr.mxu1 %v612_v0  ;;  %495 = vmatprep.subr.mxu0 %v612_v0 }
  0x53   :  { %465 = vmatpush3.msra.mxu1 %v177_v19  ;;  %496 = vmatpush3.msra.mxu0 %v286_v49 }
  0x54   :  { %497 = vmatprep.subr.mxu0 %v612_v0 }
  0x55   :  { %498 = vmatpush3.msra.mxu0 %v285_v50 }
  0x56   :  { %499 = vmatprep.subr.mxu0 %v612_v0 }
  0x57   :  { %500 = vmatpush3.msra.mxu0 %v284_v51 }
  0xf7   :  { %v159_v21 = vpop.f32.mrf.mxu0 }
  0xf8   :  { %v160_v22 = vadd.f32 %v386_v20, %v159_v21 }
  0xf9   :  { %v433_v23 = vpop.f32.mrf.mxu0 }
  0xfa   :  { %v163_v24 = vmin.f32 %v160_v22, 20.0  ;;  %vm164_vm3 = vcmp.gt.f32.partialorder %v160_v22, 20.0 }
  0xfc   :  { %v165_v25 = vmul.f32 1.442695, %v163_v24 }
  0xfe   :  { %512 = vpow2.f32 %v165_v25 }
 0x10b   :  { %v513_v26 = vpop.eup %512 }
 0x10c   :  { %v167_v27 = vadd.f32 1.0, %v513_v26  ;;  %v170_v28 = vmul.f32 -0.5, %v513_v26  ;;  %v173_v30 = vand.u32 2147483647, %v513_v26 }
 0x10e   :  { %514 = vlog2.f32 %v167_v27  ;;  %v171_v29 = vadd.f32 1.0, %v170_v28  ;;  %vm174_vm2 = vcmp.lt.f32.partialorder %v173_v30, 0.0004427343 }
 0x110   :  { %v172_v33 = vmul.f32 %v513_v26, %v171_v29 }
 0x11b   :  { %v515_v31 = vpop.eup %514 }
 0x11c   :  { %v169_v32 = vmul.f32 0.6931472, %v515_v31 }
 0x11e   :  { %v175_v34 = vsel %vm174_vm2, %v172_v33, %v169_v32 }
 0x11f   :  { %v176_v35 = vsel %vm164_vm3, %v160_v22, %v175_v34 }
 0x120   :  { %467 = vmatmul.mubr.f32.vlgmr.msra.gmra.mxu1 %v176_v35 }
 0x1e0   :  { %v266_v53 = vpop.f32.mrf.mxu1 }
 0x1e1   :  { %v267_v54 = vadd.f32 %v388_v52, %v266_v53 }
 0x1e2   :  { %v468_v55 = vpop.f32.mrf.mxu1 }
 0x1e3   :  { %v270_v56 = vmin.f32 %v267_v54, 20.0  ;;  %vm271_vm5 = vcmp.gt.f32.partialorder %v267_v54, 20.0 }
 0x1e5   :  { %v272_v57 = vmul.f32 1.442695, %v270_v56 }
 0x1e7   :  { %516 = vpow2.f32 %v272_v57 }
 0x1f4   :  { %v517_v58 = vpop.eup %516 }
 0x1f5   :  { %v274_v59 = vadd.f32 1.0, %v517_v58  ;;  %v277_v60 = vmul.f32 -0.5, %v517_v58  ;;  %v280_v62 = vand.u32 2147483647, %v517_v58 }
 0x1f7   :  { %518 = vlog2.f32 %v274_v59  ;;  %v278_v61 = vadd.f32 1.0, %v277_v60  ;;  %vm281_vm4 = vcmp.lt.f32.partialorder %v280_v62, 0.0004427343 }
 0x1f9   :  { %v279_v0 = vmul.f32 %v517_v58, %v278_v61 }
 0x204   :  { %v519_v63 = vpop.eup %518 }
 0x205   :  { %v276_v1 = vmul.f32 0.6931472, %v519_v63 }
 0x207   :  { %v282_v2 = vsel %vm281_vm4, %v279_v0, %v276_v1 }
 0x208   :  { %v283_v3 = vsel %vm271_vm5, %v267_v54, %v282_v2 }
 0x209   :  { %502 = vmatmul.mubr.f32.vlgmr.msra.gmra.mxu0 %v283_v3 }
 0x2c9   :  { %v373_v5 = vpop.f32.mrf.mxu0 }
 0x2ca   :  { %v374_v6 = vadd.f32 %v389_v4, %v373_v5 }
 0x2cb   :  { %v503_v7 = vpop.f32.mrf.mxu0 }
 0x2cc   :  { %378 = vst.msk [vmem:[%s722_s7] sm:$0xff] %vm377_vm6, %v374_v6 }
 0x2cd   :  { %383 = vsyncpa [#allocation3], 1 }
 0x2ce   :  { %384 = vsyncpa [#allocation5], 1 }
 0x2cf   :  { %385 = vsyncpa [#allocation8], 1 }

// kernel: network_forward.1
= control target key start
LH: loop header
LB: loop body
LE: loop exit
PB: predicated region body
PF: predicated region fallthrough
CT: control target
= control target key end

     0   :  { %12 = vsyncpa [#allocation3], 0  ;;  %s715_s0 = inlined_call_operand.vmem [shape: f32[8,16], index: 0, kind: input, shape index: {}]   ;;  %s716_s1 = inlined_call_operand.hbm [shape: f32[16,128], index: 1, kind: input, shape index: {}]   ;;  %s717_s2 = inlined_call_operand.vmem [shape: f32[1,128], index: 2, kind: input, shape index: {}]   ;;  %s718_s3 = inlined_call_operand.hbm [shape: f32[128,128], index: 3, kind: input, shape index: {}]   ;;  %s719_s4 = inlined_call_operand.vmem [shape: f32[1,128], index: 4, kind: input, shape index: {}]   ;;  %s720_s5 = inlined_call_operand.hbm [shape: f32[128,128], index: 5, kind: input, shape index: {}]   ;;  %s721_s6 = inlined_call_operand.hbm [shape: f32[1,128], index: 6, kind: input, shape index: {}]   ;;  %s722_s7 = inlined_call_operand.vmem [shape: f32[8,4], index: 7, kind: output, shape index: {}]  }
   0x1   :  { %13 = vsyncpa [#allocation5], 0 }
   0x2   :  { %14 = vsyncpa [#allocation8], 0  ;;  %s606_s24 = smov [#allocation4]   ;;  %s607_s26 = smov [#allocation2]  }
   0x3   :  { %s36_s25 = sshll.u32 %s606_s24, 4  ;;  %s22_s27 = sshll.u32 %s607_s26, 4  ;;  %s37_s25 = int_to_ptr.vmem [resolvable:$true] %s36_s25  ;;  %s23_s27 = int_to_ptr.vmem [resolvable:$true] %s22_s27 }
   0x4   :  { %s528_s28 = scalar_lea.vmem %s37_s25, 2048  ;;  %p533_p1 = scmp.lt.s32.totalorder %s37_s25, %s37_s25 }
   0x5   :  { %p529_p0 = scmp.ne.s32.totalorder %s37_s25, %s528_s28  ;;  %p534_p2 = scmp.lt.s32.totalorder %s528_s28, %s528_s28 }
   0x7   :  { %p535_p3 = por %p534_p2, %p533_p1 }
   0x9   :  { %p536_p4 = pnand %p535_p3, %p529_p0 }
   0xb   :  { %539 = shalt.err (!%p536_p4)
}
   0xc   :  { %s608_s29 = smov 128   ;;  %s609_s30 = smov 8  }
   0xd   :  { %42 = dma.hbm_to_vmem [thread:$0]  %s718_s3, 2048, %s37_s25, [#allocation5], %s608_s29, %s608_s29, %s609_s30  }
   0xe   :  { %s548_s10 = scalar_lea.vmem %s23_s27, 256  ;;  %p553_p6 = scmp.lt.s32.totalorder %s23_s27, %s23_s27 }
   0xf   :  { %p549_p5 = scmp.ne.s32.totalorder %s23_s27, %s548_s10  ;;  %p554_p7 = scmp.lt.s32.totalorder %s548_s10, %s548_s10 }
  0x11   :  { %p555_p8 = por %p554_p7, %p553_p6 }
  0x13   :  { %p556_p9 = pnand %p555_p8, %p549_p5 }
  0x15   :  { %559 = shalt.err (!%p556_p9)
}
  0x16   :  { %28 = dma.hbm_to_vmem [thread:$0]  %s716_s1, 256, %s23_s27, [#allocation3], %s608_s29, %s608_s29, %s609_s30  }
  0x17   :  { %s610_s13 = smov [#allocation6]   ;;  %s611_s15 = smov [#allocation7]  }
  0x18   :  { %s50_s14 = sshll.u32 %s610_s13, 4  ;;  %s63_s16 = sshll.u32 %s611_s15, 4  ;;  %s51_s14 = int_to_ptr.vmem [resolvable:$true] %s50_s14  ;;  %s64_s16 = int_to_ptr.vmem [resolvable:$true] %s63_s16 }
  0x19   :  { %s568_s17 = scalar_lea.vmem %s51_s14, 2048  ;;  %p573_p11 = scmp.lt.s32.totalorder %s51_s14, %s51_s14 }
  0x1a   :  { %p569_p10 = scmp.ne.s32.totalorder %s51_s14, %s568_s17  ;;  %p574_p12 = scmp.lt.s32.totalorder %s568_s17, %s568_s17 }
  0x1c   :  { %p575_p13 = por %p574_p12, %p573_p11 }
  0x1e   :  { %p576_p0 = pnand %p575_p13, %p569_p10 }
  0x20   :  { %579 = shalt.err (!%p576_p0)
}
  0x21   :  { %56 = dma.hbm_to_vmem [thread:$0]  %s720_s5, 2048, %s51_s14, [#allocation5], %s608_s29, %s608_s29, %s609_s30  }
  0x22   :  { %s588_s19 = scalar_lea.vmem %s64_s16, 16  ;;  %s592_s1 = scalar_lea.vmem %s64_s16, 32 }
  0x23   :  { %p589_p1 = scmp.ne.s32.totalorder %s64_s16, %s588_s19  ;;  %p593_p2 = scmp.lt.s32.totalorder %s64_s16, %s64_s16 }
  0x24   :  { %p594_p3 = scmp.lt.s32.totalorder %s592_s1, %s588_s19 }
  0x26   :  { %p595_p4 = por %p594_p3, %p593_p2 }
  0x28   :  { %p596_p5 = pnand %p595_p4, %p589_p1 }
  0x2a   :  { %599 = shalt.err (!%p596_p5)
}
  0x2b   :  { %66 = dma.hbm_to_vmem [thread:$0]  %s721_s6, 16, %s64_s16, [#allocation8]  }
  0x2c   :  { %600 = dma.done.wait [#allocation3], 256  }
  0x2d   :  { %601 = vsyncadd [#allocation3], 4294967040 }
  0x2e   :  { %602 = dma.done.wait [#allocation5], 4096  }
  0x2f   :  { %603 = vsyncadd [#allocation5], 4294963200 }
  0x30   :  { %604 = dma.done.wait [#allocation8], 16  }
  0x31   :  { %605 = vsyncadd [#allocation8], 4294967280  ;;  %v612_v0 = vmov 0.0   ;;  %vm613_vm0 = vmmov 0   ;;  %v81_v1 = vld [vmem:[#allocation2 + $0x8] sm:$0xff]  ;;  %v80_v2 = vld [vmem:[#allocation2] sm:$0xff] }
  0x32   :  { %427 = vmatprep.subr.mxu0 %v612_v0  ;;  %431 = vmatprep.mubr.msk.f32.mxu0 %vm613_vm0, %v612_v0  ;;  %v79_v3 = vld [vmem:[%s715_s0] sm:$0xff]  ;;  %vm89_vm1 = vcmask 130048   ;;  %v192_v4 = vld [vmem:[#allocation4 + $0x78] sm:$0xff]  ;;  %v190_v6 = vld [vmem:[#allocation4 + $0x68] sm:$0xff]  ;;  %vm377_vm6 = vcmask 31744  }
  0x33   :  { %434 = vmatprep.subr.mxu1 %v612_v0  ;;  %466 = vmatprep.mubr.msk.f32.mxu1 %vm613_vm0, %v612_v0  ;;  %v191_v5 = vld [vmem:[#allocation4 + $0x70] sm:$0xff]  ;;  %v189_v7 = vld [vmem:[#allocation4 + $0x60] sm:$0xff]  ;;  %v188_v8 = vld [vmem:[#allocation4 + $0x58] sm:$0xff] }
  0x34   :  { %428 = vmatpush3.msra.mxu0 %v81_v1  ;;  %435 = vmatpush3.msra.mxu1 %v192_v4  ;;  %v187_v9 = vld [vmem:[#allocation4 + $0x50] sm:$0xff]  ;;  %v186_v10 = vld [vmem:[#allocation4 + $0x48] sm:$0xff]  ;;  %v185_v11 = vld [vmem:[#allocation4 + $0x40] sm:$0xff] }
  0x35   :  { %429 = vmatprep.subr.mxu0 %v612_v0  ;;  %436 = vmatprep.subr.mxu1 %v612_v0  ;;  %v184_v12 = vld [vmem:[#allocation4 + $0x38] sm:$0xff]  ;;  %v183_v13 = vld [vmem:[#allocation4 + $0x30] sm:$0xff]  ;;  %v182_v14 = vld [vmem:[#allocation4 + $0x28] sm:$0xff] }
  0x36   :  { %430 = vmatpush3.msra.mxu0 %v80_v2  ;;  %437 = vmatpush3.msra.mxu1 %v191_v5  ;;  %v181_v15 = vld [vmem:[#allocation4 + $0x20] sm:$0xff]  ;;  %v180_v16 = vld [vmem:[#allocation4 + $0x18] sm:$0xff]  ;;  %v179_v17 = vld [vmem:[#allocation4 + $0x10] sm:$0xff] }
  0x37   :  { %432 = vmatmul.mubr.msk.f32.vlgmr.msra.gmra.mxu0 %vm89_vm1, %v79_v3  ;;  %469 = vmatprep.subr.mxu0 %v612_v0  ;;  %v178_v18 = vld [vmem:[#allocation4 + $0x8] sm:$0xff]  ;;  %v177_v19 = vld [vmem:[#allocation4] sm:$0xff]  ;;  %v386_v20 = vld [vmem:[%s717_s2] ss:$0 sm:$0xff] }
  0x38   :  { %501 = vmatprep.mubr.msk.f32.mxu0 %vm613_vm0, %v612_v0  ;;  %438 = vmatprep.subr.mxu1 %v612_v0  ;;  %v299_v36 = vld [vmem:[#allocation6 + $0x78] sm:$0xff]  ;;  %v298_v37 = vld [vmem:[#allocation6 + $0x70] sm:$0xff]  ;;  %v297_v38 = vld [vmem:[#allocation6 + $0x68] sm:$0xff] }
  0x39   :  { %439 = vmatpush3.msra.mxu1 %v190_v6  ;;  %470 = vmatpush3.msra.mxu0 %v299_v36  ;;  %v296_v39 = vld [vmem:[#allocation6 + $0x60] sm:$0xff]  ;;  %v295_v40 = vld [vmem:[#allocation6 + $0x58] sm:$0xff]  ;;  %v294_v41 = vld [vmem:[#allocation6 + $0x50] sm:$0xff] }
  0x3a   :  { %440 = vmatprep.subr.mxu1 %v612_v0  ;;  %471 = vmatprep.subr.mxu0 %v612_v0  ;;  %v293_v42 = vld [vmem:[#allocation6 + $0x48] sm:$0xff]  ;;  %v292_v43 = vld [vmem:[#allocation6 + $0x40] sm:$0xff]  ;;  %v291_v44 = vld [vmem:[#allocation6 + $0x38] sm:$0xff] }
  0x3b   :  { %441 = vmatpush3.msra.mxu1 %v189_v7  ;;  %472 = vmatpush3.msra.mxu0 %v298_v37  ;;  %v290_v45 = vld [vmem:[#allocation6 + $0x30] sm:$0xff]  ;;  %v289_v46 = vld [vmem:[#allocation6 + $0x28] sm:$0xff]  ;;  %v288_v47 = vld [vmem:[#allocation6 + $0x20] sm:$0xff] }
  0x3c   :  { %442 = vmatprep.subr.mxu1 %v612_v0  ;;  %473 = vmatprep.subr.mxu0 %v612_v0  ;;  %v287_v48 = vld [vmem:[#allocation6 + $0x18] sm:$0xff]  ;;  %v286_v49 = vld [vmem:[#allocation6 + $0x10] sm:$0xff]  ;;  %v285_v50 = vld [vmem:[#allocation6 + $0x8] sm:$0xff] }
  0x3d   :  { %443 = vmatpush3.msra.mxu1 %v188_v8  ;;  %474 = vmatpush3.msra.mxu0 %v297_v38  ;;  %v284_v51 = vld [vmem:[#allocation6] sm:$0xff]  ;;  %v388_v52 = vld [vmem:[%s719_s4] ss:$0 sm:$0xff] }
  0x3e   :  { %444 = vmatprep.subr.mxu1 %v612_v0  ;;  %475 = vmatprep.subr.mxu0 %v612_v0  ;;  %v389_v4 = vld [vmem:[#allocation7] ss:$0 sm:$0xff] }
  0x3f   :  { %445 = vmatpush3.msra.mxu1 %v187_v9  ;;  %476 = vmatpush3.msra.mxu0 %v296_v39 }
  0x40   :  { %446 = vmatprep.subr.mxu1 %v612_v0  ;;  %477 = vmatprep.subr.mxu0 %v612_v0 }
  0x41   :  { %447 = vmatpush3.msra.mxu1 %v186_v10  ;;  %478 = vmatpush3.msra.mxu0 %v295_v40 }
  0x42   :  { %448 = vmatprep.subr.mxu1 %v612_v0  ;;  %479 = vmatprep.subr.mxu0 %v612_v0 }
  0x43   :  { %449 = vmatpush3.msra.mxu1 %v185_v11  ;;  %480 = vmatpush3.msra.mxu0 %v294_v41 }
  0x44   :  { %450 = vmatprep.subr.mxu1 %v612_v0  ;;  %481 = vmatprep.subr.mxu0 %v612_v0 }
  0x45   :  { %451 = vmatpush3.msra.mxu1 %v184_v12  ;;  %482 = vmatpush3.msra.mxu0 %v293_v42 }
  0x46   :  { %452 = vmatprep.subr.mxu1 %v612_v0  ;;  %483 = vmatprep.subr.mxu0 %v612_v0 }
  0x47   :  { %453 = vmatpush3.msra.mxu1 %v183_v13  ;;  %484 = vmatpush3.msra.mxu0 %v292_v43 }
  0x48   :  { %454 = vmatprep.subr.mxu1 %v612_v0  ;;  %485 = vmatprep.subr.mxu0 %v612_v0 }
  0x49   :  { %455 = vmatpush3.msra.mxu1 %v182_v14  ;;  %486 = vmatpush3.msra.mxu0 %v291_v44 }
  0x4a   :  { %456 = vmatprep.subr.mxu1 %v612_v0  ;;  %487 = vmatprep.subr.mxu0 %v612_v0 }
  0x4b   :  { %457 = vmatpush3.msra.mxu1 %v181_v15  ;;  %488 = vmatpush3.msra.mxu0 %v290_v45 }
  0x4c   :  { %458 = vmatprep.subr.mxu1 %v612_v0  ;;  %489 = vmatprep.subr.mxu0 %v612_v0 }
  0x4d   :  { %459 = vmatpush3.msra.mxu1 %v180_v16  ;;  %490 = vmatpush3.msra.mxu0 %v289_v46 }
  0x4e   :  { %460 = vmatprep.subr.mxu1 %v612_v0  ;;  %491 = vmatprep.subr.mxu0 %v612_v0 }
  0x4f   :  { %461 = vmatpush3.msra.mxu1 %v179_v17  ;;  %492 = vmatpush3.msra.mxu0 %v288_v47 }
  0x50   :  { %462 = vmatprep.subr.mxu1 %v612_v0  ;;  %493 = vmatprep.subr.mxu0 %v612_v0 }
  0x51   :  { %463 = vmatpush3.msra.mxu1 %v178_v18  ;;  %494 = vmatpush3.msra.mxu0 %v287_v48 }
  0x52   :  { %464 = vmatprep.subr.mxu1 %v612_v0  ;;  %495 = vmatprep.subr.mxu0 %v612_v0 }
  0x53   :  { %465 = vmatpush3.msra.mxu1 %v177_v19  ;;  %496 = vmatpush3.msra.mxu0 %v286_v49 }
  0x54   :  { %497 = vmatprep.subr.mxu0 %v612_v0 }
  0x55   :  { %498 = vmatpush3.msra.mxu0 %v285_v50 }
  0x56   :  { %499 = vmatprep.subr.mxu0 %v612_v0 }
  0x57   :  { %500 = vmatpush3.msra.mxu0 %v284_v51 }
  0xf7   :  { %v159_v21 = vpop.f32.mrf.mxu0 }
  0xf8   :  { %v160_v22 = vadd.f32 %v386_v20, %v159_v21 }
  0xf9   :  { %v433_v23 = vpop.f32.mrf.mxu0 }
  0xfa   :  { %v163_v24 = vmin.f32 %v160_v22, 20.0  ;;  %vm164_vm3 = vcmp.gt.f32.partialorder %v160_v22, 20.0 }
  0xfc   :  { %v165_v25 = vmul.f32 1.442695, %v163_v24 }
  0xfe   :  { %512 = vpow2.f32 %v165_v25 }
 0x10b   :  { %v513_v26 = vpop.eup %512 }
 0x10c   :  { %v167_v27 = vadd.f32 1.0, %v513_v26  ;;  %v170_v28 = vmul.f32 -0.5, %v513_v26  ;;  %v173_v30 = vand.u32 2147483647, %v513_v26 }
 0x10e   :  { %514 = vlog2.f32 %v167_v27  ;;  %v171_v29 = vadd.f32 1.0, %v170_v28  ;;  %vm174_vm2 = vcmp.lt.f32.partialorder %v173_v30, 0.0004427343 }
 0x110   :  { %v172_v33 = vmul.f32 %v513_v26, %v171_v29 }
 0x11b   :  { %v515_v31 = vpop.eup %514 }
 0x11c   :  { %v169_v32 = vmul.f32 0.6931472, %v515_v31 }
 0x11e   :  { %v175_v34 = vsel %vm174_vm2, %v172_v33, %v169_v32 }
 0x11f   :  { %v176_v35 = vsel %vm164_vm3, %v160_v22, %v175_v34 }
 0x120   :  { %467 = vmatmul.mubr.f32.vlgmr.msra.gmra.mxu1 %v176_v35 }
 0x1e0   :  { %v266_v53 = vpop.f32.mrf.mxu1 }
 0x1e1   :  { %v267_v54 = vadd.f32 %v388_v52, %v266_v53 }
 0x1e2   :  { %v468_v55 = vpop.f32.mrf.mxu1 }
 0x1e3   :  { %v270_v56 = vmin.f32 %v267_v54, 20.0  ;;  %vm271_vm5 = vcmp.gt.f32.partialorder %v267_v54, 20.0 }
 0x1e5   :  { %v272_v57 = vmul.f32 1.442695, %v270_v56 }
 0x1e7   :  { %516 = vpow2.f32 %v272_v57 }
 0x1f4   :  { %v517_v58 = vpop.eup %516 }
 0x1f5   :  { %v274_v59 = vadd.f32 1.0, %v517_v58  ;;  %v277_v60 = vmul.f32 -0.5, %v517_v58  ;;  %v280_v62 = vand.u32 2147483647, %v517_v58 }
 0x1f7   :  { %518 = vlog2.f32 %v274_v59  ;;  %v278_v61 = vadd.f32 1.0, %v277_v60  ;;  %vm281_vm4 = vcmp.lt.f32.partialorder %v280_v62, 0.0004427343 }
 0x1f9   :  { %v279_v0 = vmul.f32 %v517_v58, %v278_v61 }
 0x204   :  { %v519_v63 = vpop.eup %518 }
 0x205   :  { %v276_v1 = vmul.f32 0.6931472, %v519_v63 }
 0x207   :  { %v282_v2 = vsel %vm281_vm4, %v279_v0, %v276_v1 }
 0x208   :  { %v283_v3 = vsel %vm271_vm5, %v267_v54, %v282_v2 }
 0x209   :  { %502 = vmatmul.mubr.f32.vlgmr.msra.gmra.mxu0 %v283_v3 }
 0x2c9   :  { %v373_v5 = vpop.f32.mrf.mxu0 }
 0x2ca   :  { %v374_v6 = vadd.f32 %v389_v4, %v373_v5 }
 0x2cb   :  { %v503_v7 = vpop.f32.mrf.mxu0 }
 0x2cc   :  { %378 = vst.msk [vmem:[%s722_s7] sm:$0xff] %vm377_vm6, %v374_v6 }
 0x2cd   :  { %383 = vsyncpa [#allocation3], 1 }
 0x2ce   :  { %384 = vsyncpa [#allocation5], 1 }
 0x2cf   :  { %385 = vsyncpa [#allocation8], 1 }

</bundles_post_ra>
